<compile_context>
chip_gen: v5e
topology: v5e:2x2
jax: 0.10.0
libtpu: 0.0.40
codegen_flags: <defaults>
</compile_context>

<pallas_src>
import functools

import jax
import jax.numpy as jnp
from jax.experimental import pallas as pl
from jax.experimental.pallas import tpu as pltpu


def _unpatchify_kernel(x_ref, o_ref, *, p_l, p_n):
    # x_ref / o_ref: (tb, tc, p_l * p_n)  -- lane-dense in both directions.
    tb, tc, _ = x_ref.shape
    x = x_ref[...]                               # unmasked, lane-dense load
    x = x.reshape(tb, tc, p_l, p_n)              # recover (pl, pn)
    x = jnp.transpose(x, (0, 1, 3, 2))           # 'pl pn -> pn pl' (XLU)
    o_ref[...] = x.reshape(tb, tc, p_n * p_l)    # unmasked, lane-dense store


def _choose_tiles(b, c, row_bytes, target_bytes):
    """Pick (tb, tc) so each block is ~target_bytes and BlockSpec-legal."""
    # TC must be a divisor of c that is a multiple of 8, or c itself
    # (the (8,128) rule applies to the last two block dims).
    tc_cands = sorted({d for d in range(1, c + 1)
                       if c % d == 0 and (d % 8 == 0 or d == c)})
    fit = [d for d in tc_cands if d * row_bytes <= target_bytes]
    tc = max(fit) if fit else min(tc_cands)

    tb_cands = sorted(d for d in range(1, b + 1) if b % d == 0)
    fit = [d for d in tb_cands if d * tc * row_bytes <= target_bytes]
    tb = max(fit) if fit else 1

    # Prefer >= 2 grid steps when the batch allows it so v7x's two
    # TensorCores both get work (harmless on single-TC v5e/v6e).
    if tb == b and b > 1 and (c // tc) == 1:
        tb = max(d for d in range(1, b) if b % d == 0)
    return tb, tc


def unpatchify(x, *, target_block_bytes=2 * 1024 * 1024):
    """rearrange 'b c pl pn -> b c (pn pl)' as a Pallas TPU kernel."""
    b, c, p_l, p_n = x.shape
    seq = p_l * p_n
    itemsize = jnp.dtype(x.dtype).itemsize

    # Free contiguous merge of the trailing dims: the kernel sees lane-dense
    # (..., pl*pn) blocks instead of a lane-sparse last dim of size pn.
    x_dense = x.reshape(b, c, seq)

    tb, tc = _choose_tiles(b, c, seq * itemsize, target_block_bytes)
    block_bytes = tb * tc * seq * itemsize
    grid = (b // tb, c // tc)

    total_bytes = b * c * seq * itemsize
    # in + out blocks, each double-buffered, plus slack.
    vmem_limit = int(max(16 * 1024 * 1024, 4 * block_bytes + 2 * 1024 * 1024))

    kernel = functools.partial(_unpatchify_kernel, p_l=p_l, p_n=p_n)
    return pl.pallas_call(
        kernel,
        out_shape=jax.ShapeDtypeStruct((b, c, seq), x.dtype),
        grid=grid,
        in_specs=[pl.BlockSpec((tb, tc, seq), lambda i, j: (i, j, 0))],
        out_specs=pl.BlockSpec((tb, tc, seq), lambda i, j: (i, j, 0)),
        compiler_params=pltpu.CompilerParams(
            dimension_semantics=("parallel", "parallel"),
            vmem_limit_bytes=vmem_limit,
        ),
        cost_estimate=pl.CostEstimate(
            flops=0, transcendentals=0, bytes_accessed=2 * total_bytes),
    )(x_dense)


if __name__ == "__main__":
    key = jax.random.PRNGKey(0)
    b, c, p_l, p_n = 2, 4, 16, 16
    x = jax.random.normal(key, (b, c, p_l, p_n), dtype=jnp.float32)

    out = jax.block_until_ready(unpatchify(x))
    ref = jnp.transpose(x, (0, 1, 3, 2)).reshape(b, c, p_n * p_l)
    assert out.shape == ref.shape, out.shape
    assert out.dtype == x.dtype
    assert jnp.array_equal(out, ref), "mismatch vs reference rearrange"

    # Slightly larger case: exercises the multi-step grid / c-tiling path.
    y = jax.random.normal(jax.random.PRNGKey(1), (2, 8, 16, 32), dtype=jnp.float32)
    out2 = jax.block_until_ready(unpatchify(y))
    ref2 = jnp.transpose(y, (0, 1, 3, 2)).reshape(2, 8, 32 * 16)
    assert jnp.array_equal(out2, ref2), "mismatch on tiled case"

    print("KERNEL_OK")
</pallas_src>

<mosaic_0001>
module attributes {stable_mosaic.version = 11 : i64} {
  func.func @_unpatchify_kernel(%arg0: i32, %arg1: i32, %arg2: memref<1x4x256xf32, #tpu.memory_space<vmem>>, %arg3: memref<1x4x256xf32, #tpu.memory_space<vmem>>) attributes {dimension_semantics = [#tpu.dimension_semantics<parallel>, #tpu.dimension_semantics<parallel>], iteration_bounds = array<i64: 2, 1>, scalar_prefetch = 0 : i64, scratch_operands = 0 : i64, tpu.core_type = #tpu.core_type<tc>, window_params = [{transform_indices = @transform_0, window_bounds = array<i64: 1, 4, 256>}, {transform_indices = @transform_1, window_bounds = array<i64: 1, 4, 256>}]} {
    %c0 = arith.constant 0 : index
    %c0_0 = arith.constant 0 : index
    %c0_1 = arith.constant 0 : index
    %0 = vector.load %arg2[%c0, %c0_0, %c0_1] : memref<1x4x256xf32, #tpu.memory_space<vmem>>, vector<1x4x256xf32>
    %1 = vector.shape_cast %0 : vector<1x4x256xf32> to vector<1x4x16x16xf32>
    %2 = tpu.transpose %1, [0, 1, 3, 2] : vector<1x4x16x16xf32> -> vector<1x4x16x16xf32>
    %3 = vector.shape_cast %2 : vector<1x4x16x16xf32> to vector<1x4x256xf32>
    %c0_2 = arith.constant 0 : index
    %c0_3 = arith.constant 0 : index
    %c0_4 = arith.constant 0 : index
    %4 = vector.load %arg3[%c0_2, %c0_3, %c0_4] : memref<1x4x256xf32, #tpu.memory_space<vmem>>, vector<1x4x256xf32>
    tpu.vector_store %arg3[%c0_2, %c0_3, %c0_4], %3 {strides = array<i32>} : memref<1x4x256xf32, #tpu.memory_space<vmem>>, vector<1x4x256xf32>,
    return
  }
  func.func @transform_0(%arg0: i32, %arg1: i32) -> (i32, i32, i32) {
    %c0_i32 = arith.constant 0 : i32
    %c0_i32_0 = arith.constant 0 : i32
    return %arg0, %arg1, %c0_i32 : i32, i32, i32
  }
  func.func @transform_1(%arg0: i32, %arg1: i32) -> (i32, i32, i32) {
    %c0_i32 = arith.constant 0 : i32
    %c0_i32_0 = arith.constant 0 : i32
    return %arg0, %arg1, %c0_i32 : i32, i32, i32
  }
}

</mosaic_0001>

<bundles_post_ra>
// kernel: tpu_custom_call.1
= control target key start
LH: loop header
LB: loop body
LE: loop exit
PB: predicated region body
PF: predicated region fallthrough
CT: control target
= control target key end

     0   :  { %6 = vsyncpa [#allocation3], 0  ;;  %s1246_s0 = inlined_call_operand.hbm [shape: f32[2,4,256], index: 0, kind: input, shape index: {}]   ;;  %s1247_s1 = inlined_call_operand.hbm [shape: f32[2,4,256], index: 1, kind: output, shape index: {}]  }
   0x1   :  { %8 = vsyncpa [#allocation3 + $0x1], 0 }
   0x2   :  { %9 = vsyncpa [#allocation4], 0 }
   0x3   :  { %11 = vsyncpa [#allocation4 + $0x1], 0  ;;  %s1013_s6 = smov 0   ;;  %s1015_s7 = smov 0  }
   0x4   :  { %s1017_s8 = smov 0   ;;  %s1019_s9 = smov 0  }
   0x5   :  { %s1021_s10 = smov 0   ;;  %s1023_s11 = smov 0  }
   0x6 LB: > { %s787_s12 = sadd.s32 4294967295, %s992_s11   ;;  %s788_s13 = sadd.s32 4294967294, %s992_s11   ;;  %s992_s11 = sphi %s1023_s11, %s17_s11   ;;  %s988_s10 = sphi %s1021_s10, %s1256_s10   ;;  %s984_s9 = sphi %s1019_s9, %s1255_s9   ;;  %s980_s8 = sphi %s1017_s8, %s1254_s8   ;;  %s976_s7 = sphi %s1015_s7, %s1253_s7   ;;  %s972_s6 = sphi %s1013_s6, %s1252_s6  }
   0x7   : > { %s29_s14 = sadd.s32 1, %s988_s10  ;;  %s38_s15 = sadd.s32 1, %s980_s8 }
   0x8   : > { %p31_p0 = scmp.ge.s32.totalorder %s29_s14, 2  ;;  %p45_p1 = scmp.ne.s32.totalorder %s980_s8, %s976_s7 }
   0x9   : > { %p46_p2 = scmp.eq.s32.totalorder %s992_s11, 0  ;;  %p51_p3 = scmp.ne.s32.totalorder %s976_s7, %s972_s6 }
   0xa   : > { %s1258_s14 = smov (%p31_p0, %s29_s14), 0  ;;  %p52_p5 = scmp.eq.s32.totalorder %s787_s12, 0 }
   0xb   : > { %p1054_p4 = por %p46_p2, %p45_p1  ;;  %s33_s17 = ssub.s32 %s988_s10, %s1258_s14 }
   0xc   : > { %p77_p6 = scmp.eq.s32.totalorder %s787_s12, 1  ;;  %p36_p7 = scmp.eq.s32.totalorder %s33_s17, 0 }
   0xd   : > { %p1060_p8 = por %p52_p5, %p51_p3  ;;  %p83_p10 = scmp.eq.s32.totalorder %s788_s13, 1 }
   0xe   : > { %p1064_p9 = por %p77_p6, %p45_p1  ;;  %p790_p12 = scmp.ge.s32.totalorder %s992_s11, 2 }
   0xf   : > { %s1069_s20 = scalar_select %p36_p7, %s980_s8, %s38_s15  }
  0x10   : > { %p1071_p11 = por %p83_p10, %p51_p3  ;;  %p820_p13 = scmp.lt.s32.totalorder %s992_s11, 2 }
  0x11   : > { %s103_s22 = sand.u32 1, %s980_s8   ;;  %s806_s24 = sshll.u32 %s988_s10, 3 }
  0x12   : > { %s791_s23 = sshll.u32 %s103_s22, 3  ;;  %s114_s27 = scalar_lea.hbm %s1246_s0, %s806_s24 }
  0x13   : > { %s107_s28 = scalar_lea.vmem [#allocation2], %s791_s23  ;;  %s116_s30 = sshll.u32 %s114_s27, 4  ;;  %s117_s30 = int_to_ptr.hbm [resolvable:$true] %s116_s30 }
  0x14   : > { %s118_s29 = sshll.u32 %s107_s28, 4  ;;  %p813_p0 = pnand %p820_p13, %p1054_p4  ;;  %s119_s29 = int_to_ptr.vmem [resolvable:$true] %s118_s29 }
  0x15   : > { %p794_p1 = scmp.ge.s32.totalorder %s992_s11, 1  ;;  %p123_p2 = scmp.lt.s32.totalorder %s992_s11, 3 }
  0x16   : > { %s104_s2 = scalar_lea.sflag [#allocation3], %s103_s22 }
  0x17   : > { %815 = dma.hbm_to_vmem [thread:$0]  (!%p813_p0), %s117_s30, 128, %s119_s29, %s104_s2  }
  0x18   : > { %p124_p3 = pnand %p794_p1, %p123_p2 }
  0x19   : > { %s1087_s3 = sand.u32 (!%p124_p3), 1, %s976_s7  }
  0x1a   : > { %127 = sbr.rel (%p124_p3) target bundleno = 523 (0x20b), region = 24  ;;  %s795_s4 = sshll.u32 (!%p124_p3), %s1087_s3, 3 }
  0x1b   : > { %s130_s5 = scalar_lea.sflag (!%p124_p3), [#allocation3], %s1087_s3  ;;  %s133_s12 = scalar_lea.vmem (!%p124_p3), [#allocation2], %s795_s4 }
  0x1f   : > { %963 = dma.done.wait (%p1060_p8), %s130_s5, 128  }
  0x20   : > { %965 = vsyncadd (%p1060_p8), %s130_s5, 4294967168  ;;  %v153_v0 = vld [vmem:[%s133_s12] sm:$0xff]  ;;  %s994_s13 = smov 112   ;;  %s995_s15 = smov 80   ;;  %v1001_v1 = vmov 1983009808  }
  0x21   : > { %157 = vrot.lane.b32.xlu1 %v153_v0, %s994_s13  ;;  %165 = vrot.lane.b32.xlu0 %v153_v0, %s995_s15  ;;  %s996_s16 = smov 48   ;;  %s997_s17 = smov 96   ;;  %v196_v2 = vunpack.c.l.s4 %v1001_v1  ;;  %vm193_vm0 = vcmask 1047556   ;;  %v1002_v10 = vmov 1934713408   ;;  %v155_v13 = vrot.slane %v153_v0, 4 }
  0x22   : > { %173 = vrot.lane.b32.xlu2 %v153_v0, %s996_s16  ;;  %s998_s22 = smov 16   ;;  %s999_s23 = smov 32   ;;  %v210_v11 = vunpack.c.l.s4 %v1002_v10  ;;  %vm656_vm1 = vcmask 130048   ;;  %vm658_vm2 = vcmask 261120   ;;  %vm660_vm3 = vcmask 392192  }
  0x23   : > { %s1000_s18 = smov 64   ;;  %v1104_v8 = vunpack.c.0.s8 %v196_v2  ;;  %s807_s24 = sshll.u32 %s984_s9, 3  ;;  %vm662_vm4 = vcmask 523264   ;;  %vm666_vm5 = vcmask 785408   ;;  %vm664_vm6 = vcmask 654336  }
  0x24   : > { %v1110_v16 = vunpack.c.0.s8 %v210_v11  ;;  %vm668_vm7 = vcmask 916480   ;;  %s698_s27 = scalar_lea.hbm %s1247_s1, %s807_s24  ;;  %s152_s9 = scalar_lea.vmem [#allocation5], %s795_s4  ;;  %vm680_vm8 = vcmask 1043456  }
  0x25   : > { %s700_s28 = sshll.u32 %s152_s9, 4  ;;  %s702_s29 = sshll.u32 %s698_s27, 4  ;;  %s701_s28 = int_to_ptr.vmem [resolvable:$true] %s700_s28  ;;  %s703_s29 = int_to_ptr.hbm [resolvable:$true] %s702_s29 }
  0x26   : > { %s685_s30 = scalar_lea.sflag [#allocation4], %s1087_s3  ;;  %s924_s2 = sshra.s32 %s703_s29, 4  ;;  %s925_s2 = int_to_ptr.hbm [resolvable:$true] %s924_s2 }
  0x27   : > { %s926_s4 = scalar_lea.hbm %s925_s2, 8  ;;  %p931_p7 = scmp.lt.s32.totalorder %s925_s2, %s1247_s1 }
  0x28   : > { %p927_p4 = scmp.ne.s32.totalorder %s925_s2, %s926_s4 }
  0x29   : > { %161 = vrot.lane.b32.xlu1 %v153_v0, %s997_s17  ;;  %181 = vrot.lane.b32.xlu0 %v153_v0, %s998_s22 }
  0x2a   : > { %177 = vrot.lane.b32.xlu2 %v153_v0, %s999_s23  ;;  %p928_p5 = pnand %p927_p4, %p1064_p9 }
  0x2c   : > { %p929_p6 = pneg %p928_p5 }
  0x31   : > { %169 = vrot.lane.b32.xlu0 %v153_v0, %s1000_s18 }
  0x7c   : > { %v174_v3 = vpop.permute.xlu2 %173 }
  0x7d   : > { %v175_v19 = vrot.slane %v174_v3, 4 }
  0x84   : > { %v178_v25 = vpop.permute.xlu2 %177 }
  0x85   : > { %v221_v33 = vrot.slane %v178_v25, 4 }
  0x93   : > { %v158_v4 = vpop.permute.xlu1 %157  ;;  %v166_v5 = vpop.permute.xlu0 %165 }
  0x94   : > { %v159_v6 = vrot.slane %v158_v4, 4  ;;  %v199_v7 = vrot.slane %v166_v5, 4 }
  0x96   : > { %v256_v9 = vsel %vm193_vm0, %v166_v5, %v159_v6  ;;  %v200_v12 = vsel %vm193_vm0, %v199_v7, %v158_v4 }
  0x97   : > { %v260_v14 = vperm.slane %v256_v9, %v1104_v8  ;;  %v204_v15 = vperm.slane %v200_v12, %v1104_v8 }
  0x99   : > { %v261_v23 = vrot.slane %v260_v14, 4  ;;  %v205_v28 = vrot.slane %v204_v15, 4 }
  0x9b   : > { %v162_v17 = vpop.permute.xlu1 %161  ;;  %v182_v18 = vpop.permute.xlu0 %181 }
  0x9c   : > { %v192_v20 = vrot.slane %v162_v17, 4  ;;  %v250_v21 = vsel %vm193_vm0, %v162_v17, %v155_v13  ;;  %v227_v22 = vrot.slane %v182_v18, 4  ;;  %v284_v32 = vsel %vm193_vm0, %v182_v18, %v175_v19 }
  0x9d   : > { %v254_v24 = vperm.slane %v250_v21, %v1104_v8  ;;  %v288_v38 = vperm.slane %v284_v32, %v1104_v8 }
  0x9e   : > { %v194_v26 = vsel %vm193_vm0, %v192_v20, %v153_v0  ;;  %v228_v27 = vsel %vm193_vm0, %v227_v22, %v174_v3 }
  0x9f   : > { %v198_v29 = vperm.slane %v194_v26, %v1104_v8  ;;  %v262_v30 = vsel %vm193_vm0, %v261_v23, %v254_v24  ;;  %v232_v35 = vperm.slane %v228_v27, %v1104_v8  ;;  %v263_v47 = vrot.slane %v254_v24, 4 }
  0xa0   : > { %v268_v31 = vperm.slane %v262_v30, %v1110_v16  ;;  %v289_v50 = vrot.slane %v288_v38, 4 }
  0xa1   : > { %v206_v34 = vsel %vm193_vm0, %v205_v28, %v198_v29  ;;  %v207_v40 = vrot.slane %v198_v29, 4  ;;  %v233_v44 = vrot.slane %v232_v35, 4  ;;  %v264_v61 = vsel %vm193_vm0, %v260_v14, %v263_v47 }
  0xa2   : > { %v273_v36 = vrot.slane %v268_v31, 4  ;;  %325 = vst [vmem:[#allocation1 + $0x10] ss:$2 sm:$0xff] %v268_v31  ;;  %v212_v37 = vperm.slane %v206_v34, %v1110_v16  ;;  %v272_v3 = vperm.slane %v264_v61, %v1110_v16 }
  0xa3   : > { %v170_v39 = vpop.permute.xlu0 %169  ;;  %v208_v54 = vsel %vm193_vm0, %v204_v15, %v207_v40 }
  0xa4   : > { %v171_v41 = vrot.slane %v170_v39, 4  ;;  %v222_v42 = vsel %vm193_vm0, %v221_v33, %v170_v39  ;;  %321 = vst [vmem:[#allocation1] ss:$2 sm:$0xff] %v212_v37  ;;  %v217_v43 = vrot.slane %v212_v37, 4  ;;  %v274_v46 = vsel %vm193_vm0, 0.0, %v273_v36 }
  0xa5   : > { %v226_v45 = vperm.slane %v222_v42, %v1104_v8  ;;  %335 = vst [vmem:[#allocation1 + $0x30] ss:$2 sm:$0xff] %v274_v46  ;;  %v216_v62 = vperm.slane %v208_v54, %v1110_v16  ;;  %v275_v10 = vrot.slane %v272_v3, 4 }
  0xa6   : > { %v278_v48 = vsel %vm193_vm0, %v178_v25, %v171_v41  ;;  %v218_v49 = vsel %vm193_vm0, 0.0, %v217_v43 }
  0xa7   : > { %v234_v51 = vsel %vm193_vm0, %v233_v44, %v226_v45  ;;  %v235_v52 = vrot.slane %v226_v45, 4  ;;  %v282_v53 = vperm.slane %v278_v48, %v1104_v8  ;;  %331 = vst [vmem:[#allocation1 + $0x20] ss:$2 sm:$0xff] %v218_v49  ;;  %v219_v5 = vrot.slane %v216_v62, 4 }
  0xa8   : > { %v240_v55 = vperm.slane %v234_v51, %v1110_v16  ;;  %v276_v18 = vsel %vm193_vm0, 0.0, %v275_v10 }
  0xa9   : > { %v290_v56 = vsel %vm193_vm0, %v289_v50, %v282_v53  ;;  %v291_v57 = vrot.slane %v282_v53, 4  ;;  %v236_v58 = vsel %vm193_vm0, %v232_v35, %v235_v52  ;;  %v220_v11 = vsel %vm193_vm0, 0.0, %v219_v5 }
  0xaa   : > { %v245_v59 = vrot.slane %v240_v55, 4  ;;  %323 = vst [vmem:[#allocation1 + $0x1] ss:$2 sm:$0xff] %v240_v55  ;;  %v296_v60 = vperm.slane %v290_v56, %v1110_v16  ;;  %v244_v1 = vperm.slane %v236_v58, %v1110_v16 }
  0xab   : > { %v292_v2 = vsel %vm193_vm0, %v288_v38, %v291_v57 }
  0xac   : > { %v246_v63 = vsel %vm193_vm0, 0.0, %v245_v59  ;;  %327 = vst [vmem:[#allocation1 + $0x11] ss:$2 sm:$0xff] %v296_v60  ;;  %v301_v0 = vrot.slane %v296_v60, 4  ;;  %v300_v6 = vperm.slane %v292_v2, %v1110_v16  ;;  %v247_v9 = vrot.slane %v244_v1, 4 }
  0xad   : > { %333 = vst [vmem:[#allocation1 + $0x21] ss:$2 sm:$0xff] %v246_v63 }
  0xae   : > { %v302_v4 = vsel %vm193_vm0, 0.0, %v301_v0  ;;  %v303_v14 = vrot.slane %v300_v6, 4  ;;  %v248_v15 = vsel %vm193_vm0, 0.0, %v247_v9 }
  0xaf   : > { %337 = vst [vmem:[#allocation1 + $0x31] ss:$2 sm:$0xff] %v302_v4 }
  0xb0   : > { %v304_v19 = vsel %vm193_vm0, 0.0, %v303_v14 }
  0xb1   : > { %v328_v7 = vld.sshfl [vmem:[#allocation1] sm:$0xff pattern:$0x75316420] }
  0xb2   : > { %360 = vxpose.xlu1.b32.start [1/2] (short) (narrow) %v328_v7, 16  ;;  %340 = vst [vmem:[#allocation1] ss:$2 sm:$0xff] %v216_v62 }
  0xb3   : > { %341 = vst [vmem:[#allocation1 + $0x1] ss:$2 sm:$0xff] %v244_v1  ;;  %v329_v12 = vld.sshfl [vmem:[#allocation1 + $0x10] sm:$0xff pattern:$0x75316420] }
  0xb4   : > { %v338_v13 = vld.sshfl [vmem:[#allocation1 + $0x20] sm:$0xff pattern:$0x75316420]  ;;  %342 = vst [vmem:[#allocation1 + $0x10] ss:$2 sm:$0xff] %v272_v3 }
  0xb5   : > { %392 = vxpose.xlu2.b32.start [1/2] (short) (narrow) %v338_v13, 16  ;;  %346 = vst [vmem:[#allocation1 + $0x20] ss:$2 sm:$0xff] %v220_v11 }
  0xb6   : > { %347 = vst [vmem:[#allocation1 + $0x21] ss:$2 sm:$0xff] %v248_v15  ;;  %v339_v17 = vld.sshfl [vmem:[#allocation1 + $0x30] sm:$0xff pattern:$0x75316420] }
  0xb7   : > { %343 = vst [vmem:[#allocation1 + $0x11] ss:$2 sm:$0xff] %v300_v6 }
  0xb8   : > { %348 = vst [vmem:[#allocation1 + $0x30] ss:$2 sm:$0xff] %v276_v18 }
  0xb9   : > { %349 = vst [vmem:[#allocation1 + $0x31] ss:$2 sm:$0xff] %v304_v19 }
  0xba   : > { %v344_v20 = vld.sshfl [vmem:[#allocation1] sm:$0xff pattern:$0x75316420]  ;;  %361 = vxpose.xlu1.b32.end [2/2] (short) (narrow) %v329_v12, 16 }
  0xbb   : > { %424 = vxpose.xlu0.b32.start [1/2] (short) (narrow) %v344_v20, 16 }
  0xbd   : > { %393 = vxpose.xlu2.b32.end [2/2] (short) (narrow) %v339_v17, 16  ;;  %v350_v22 = vld.sshfl [vmem:[#allocation1 + $0x20] sm:$0xff pattern:$0x75316420] }
  0xbe   : > { %v345_v21 = vld.sshfl [vmem:[#allocation1 + $0x10] sm:$0xff pattern:$0x75316420] }
  0xc0   : > { %v351_v23 = vld.sshfl [vmem:[#allocation1 + $0x30] sm:$0xff pattern:$0x75316420] }
  0xc3   : > { %425 = vxpose.xlu0.b32.end [2/2] (short) (narrow) %v345_v21, 16 }
  0xc5   : > { %456 = vxpose.xlu2.b32.start [1/2] (short) (narrow) %v350_v22, 16 }
  0xcd   : > { %457 = vxpose.xlu2.b32.end [2/2] (short) (narrow) %v351_v23, 16 }
 0x14e   : > { %v408_v24 = vpop.trf.xlu2 }
 0x14f   : > { %v502_v28 = vrot.slane %v408_v24, 4 }
 0x156   : > { %v409_v25 = vpop.trf.xlu2  ;;  %v376_v26 = vpop.trf.xlu1 }
 0x157   : > { %v490_v27 = vrot.slane %v376_v26, 4  ;;  %v558_v46 = vrot.slane %v409_v25, 4 }
 0x15e   : > { %v472_v29 = vpop.trf.xlu2  ;;  %v377_v37 = vpop.trf.xlu1 }
 0x15f   : > { %v440_v30 = vpop.trf.xlu0  ;;  %v500_v31 = vrot.slane %v472_v29, 4  ;;  %v503_v32 = vsel %vm193_vm0, %v472_v29, %v502_v28  ;;  %v546_v44 = vrot.slane %v377_v37, 4 }
 0x160   : > { %v488_v33 = vrot.slane %v440_v30, 4  ;;  %v491_v34 = vsel %vm193_vm0, %v440_v30, %v490_v27  ;;  %v511_v35 = vperm.slane %v503_v32, %v1104_v8 }
 0x161   : > { %v501_v36 = vsel %vm193_vm0, %v500_v31, %v408_v24  ;;  %v499_v39 = vperm.slane %v491_v34, %v1104_v8 }
 0x162   : > { %v489_v38 = vsel %vm193_vm0, %v488_v33, %v376_v26  ;;  %v507_v40 = vperm.slane %v501_v36, %v1104_v8  ;;  %v524_v41 = vrot.slane %v511_v35, 4 }
 0x163   : > { %v495_v42 = vperm.slane %v489_v38, %v1104_v8  ;;  %v526_v15 = vrot.slane %v499_v39, 4 }
 0x164   : > { %v512_v43 = vrot.slane %v507_v40, 4  ;;  %v525_v45 = vsel %vm193_vm0, %v524_v41, %v499_v39 }
 0x165   : > { %v514_v47 = vrot.slane %v495_v42, 4  ;;  %v531_v48 = vperm.slane %v525_v45, %v1110_v16  ;;  %v527_v19 = vsel %vm193_vm0, %v511_v35, %v526_v15 }
 0x166   : > { %v473_v49 = vpop.trf.xlu2  ;;  %v513_v50 = vsel %vm193_vm0, %v512_v43, %v495_v42  ;;  %v535_v21 = vperm.slane %v527_v19, %v1110_v16 }
 0x167   : > { %v441_v51 = vpop.trf.xlu0  ;;  %v556_v52 = vrot.slane %v473_v49, 4  ;;  %v559_v53 = vsel %vm193_vm0, %v473_v49, %v558_v46  ;;  %613 = vrot.lane.b32.xlu0 %v531_v48, %s1000_s18  ;;  %v515_v54 = vsel %vm193_vm0, %v507_v40, %v514_v47  ;;  %v540_v55 = vrot.slane %v531_v48, 4 }
 0x168   : > { %v544_v56 = vrot.slane %v441_v51, 4  ;;  %v547_v57 = vsel %vm193_vm0, %v441_v51, %v546_v44  ;;  %v567_v58 = vperm.slane %v559_v53, %v1104_v8  ;;  %v523_v59 = vperm.slane %v515_v54, %v1110_v16 }
 0x169   : > { %v541_v60 = vsel %vm193_vm0, 0.0, %v540_v55  ;;  %v519_v61 = vperm.slane %v513_v50, %v1110_v16  ;;  %v557_v63 = vsel %vm193_vm0, %v556_v52, %v409_v25  ;;  %v555_v2 = vperm.slane %v547_v57, %v1104_v8 }
 0x16a   : > { %v545_v62 = vsel %vm193_vm0, %v544_v56, %v377_v37  ;;  %v580_v0 = vrot.slane %v567_v58, 4  ;;  %605 = vrot.lane.b32.xlu1 %v523_v59, %s999_s23  ;;  %617 = vrot.lane.b32.xlu2 %v541_v60, %s995_s15  ;;  %v563_v5 = vperm.slane %v557_v63, %v1104_v8  ;;  %v538_v6 = vrot.slane %v523_v59, 4 }
 0x16b   : > { %v551_v1 = vperm.slane %v545_v62, %v1104_v8  ;;  %v536_v3 = vrot.slane %v519_v61, 4  ;;  %v582_v10 = vrot.slane %v555_v2, 4  ;;  %v542_v25 = vrot.slane %v535_v21, 4 }
 0x16c   : > { %v581_v9 = vsel %vm193_vm0, %v580_v0, %v555_v2  ;;  %v539_v13 = vsel %vm193_vm0, 0.0, %v538_v6  ;;  %v568_v22 = vrot.slane %v563_v5, 4 }
 0x16d   : > { %v570_v4 = vrot.slane %v551_v1, 4  ;;  %v537_v7 = vsel %vm193_vm0, 0.0, %v536_v3  ;;  %v587_v14 = vperm.slane %v581_v9, %v1110_v16  ;;  %v583_v8 = vsel %vm193_vm0, %v567_v58, %v582_v10 }
 0x16e   : > { %v591_v18 = vperm.slane %v583_v8, %v1110_v16  ;;  %v569_v27 = vsel %vm193_vm0, %v568_v22, %v551_v1  ;;  %v543_v29 = vsel %vm193_vm0, 0.0, %v542_v25 }
 0x16f   : > { %601 = vrot.lane.b32.xlu0 %v537_v7, %s998_s22  ;;  %v571_v11 = vsel %vm193_vm0, %v563_v5, %v570_v4  ;;  %v596_v17 = vrot.slane %v587_v14, 4  ;;  %v575_v30 = vperm.slane %v569_v27, %v1110_v16 }
 0x170   : > { %v579_v12 = vperm.slane %v571_v11, %v1110_v16  ;;  %v598_v23 = vrot.slane %v591_v18, 4 }
 0x171   : > { %v597_v20 = vsel %vm193_vm0, 0.0, %v596_v17  ;;  %v592_v31 = vrot.slane %v575_v30, 4 }
 0x172   : > { %609 = vrot.lane.b32.xlu1 %v539_v13, %s996_s16  ;;  %633 = vrot.lane.b32.xlu2 %v579_v12, %s999_s23  ;;  %v594_v24 = vrot.slane %v579_v12, 4  ;;  %v599_v26 = vsel %vm193_vm0, 0.0, %v598_v23 }
 0x173   : > { %v593_v32 = vsel %vm193_vm0, 0.0, %v592_v31 }
 0x174   : > { %v595_v28 = vsel %vm193_vm0, 0.0, %v594_v24 }
 0x177   : > { %641 = vrot.lane.b32.xlu0 %v587_v14, %s1000_s18 }
 0x17a   : > { %649 = vrot.lane.b32.xlu1 %v591_v18, %s997_s17  ;;  %645 = vrot.lane.b32.xlu2 %v597_v20, %s995_s15 }
 0x17f   : > { %653 = vrot.lane.b32.xlu0 %v599_v26, %s994_s13 }
 0x182   : > { %637 = vrot.lane.b32.xlu1 %v595_v28, %s996_s16  ;;  %625 = vrot.lane.b32.xlu2 %v543_v29, %s994_s13  ;;  %s930_s13 = scalar_lea.hbm %s1247_s1, 16 }
 0x183   : > { %p932_p8 = scmp.lt.s32.totalorder %s930_s13, %s926_s4 }
 0x185   : > { %p933_p10 = por %p932_p8, %p931_p7 }
 0x187   : > { %p934_p13 = pnand %p933_p10, %p929_p6 }
 0x18a   : > { %629 = vrot.lane.b32.xlu1 %v593_v32, %s998_s22 }
 0x192   : > { %621 = vrot.lane.b32.xlu1 %v535_v21, %s997_s17 }
 0x1c4   : > { %v618_v36 = vpop.permute.xlu2 %617 }
 0x1cc   : > { %v634_v39 = vpop.permute.xlu2 %633 }
 0x1d4   : > { %v646_v42 = vpop.permute.xlu2 %645 }
 0x1d9   : > { %v614_v34 = vpop.permute.xlu0 %613 }
 0x1dc   : > { %v606_v33 = vpop.permute.xlu1 %605  ;;  %v626_v58 = vpop.permute.xlu2 %625 }
 0x1e1   : > { %v602_v38 = vpop.permute.xlu0 %601 }
 0x1e2   : > { %v657_v40 = vsel %vm656_vm1, %v519_v61, %v602_v38 }
 0x1e3   : > { %v659_v43 = vsel %vm658_vm2, %v657_v40, %v606_v33 }
 0x1e4   : > { %v610_v35 = vpop.permute.xlu1 %609 }
 0x1e5   : > { %v661_v46 = vsel %vm660_vm3, %v659_v43, %v610_v35 }
 0x1e6   : > { %v663_v50 = vsel %vm662_vm4, %v661_v46, %v614_v34 }
 0x1e7   : > { %v665_v56 = vsel %vm664_vm6, %v663_v50, %v618_v36 }
 0x1e9   : > { %v642_v41 = vpop.permute.xlu0 %641 }
 0x1ec   : > { %v650_v37 = vpop.permute.xlu1 %649 }
 0x1f1   : > { %v654_v52 = vpop.permute.xlu0 %653 }
 0x1f4   : > { %v638_v16 = vpop.permute.xlu1 %637 }
 0x1fc   : > { %v630_v44 = vpop.permute.xlu1 %629 }
 0x1fd   : > { %v670_v45 = vsel %vm656_vm1, %v575_v30, %v630_v44 }
 0x1fe   : > { %v671_v47 = vsel %vm658_vm2, %v670_v45, %v634_v39 }
 0x1ff   : > { %v672_v48 = vsel %vm660_vm3, %v671_v47, %v638_v16 }
 0x200   : > { %v673_v49 = vsel %vm662_vm4, %v672_v48, %v642_v41 }
 0x201   : > { %v674_v51 = vsel %vm664_vm6, %v673_v49, %v646_v42 }
 0x202   : > { %v675_v53 = vsel %vm666_vm5, %v674_v51, %v650_v37 }
 0x203   : > { %v676_v54 = vsel %vm668_vm7, %v675_v53, %v654_v52 }
 0x204   : > { %v622_v55 = vpop.permute.xlu1 %621  ;;  %v679_v57 = vrot.slane %v676_v54, 4 }
 0x205   : > { %v667_v59 = vsel %vm666_vm5, %v665_v56, %v622_v55 }
 0x206   : > { %v669_v60 = vsel %vm668_vm7, %v667_v59, %v626_v58 }
 0x207   : > { %v681_v61 = vsel %vm680_vm8, %v669_v60, %v679_v57 }
 0x208   : > { %683 = vst [vmem:[%s152_s9] sm:$0xff] %v681_v61 }
 0x209   : > { %937 = shalt.err (!%p934_p13)
}
 0x20a   : > { %810 = dma.vmem_to_hbm [thread:$0]  (%p1064_p9), %s701_s28, 128, %s703_s29, %s685_s30  }
 0x20b PF: > { %s714_s3 = sand.u32 1, %s972_s6   ;;  %p817_p0 = pnand %p790_p12, %p1071_p11 }
 0x20c   : > { %s715_s17 = scalar_lea.sflag [#allocation4], %s714_s3 }
 0x20d   : > { %p818_p1 = pneg %p817_p0 }
 0x20f   : > { %967 = dma.done.wait (%p818_p1), %s715_s17, 128  }
 0x210   : > { %969 = vsyncadd (%p818_p1), %s715_s17, 4294967168  ;;  %s17_s11 = sadd.s32 1, %s992_s11   ;;  %s1252_s6 = smov %s976_s7 }
 0x211   : > { %p14_p2 = scmp.ge.s32.totalorder %s17_s11, 4   ;;  %s1253_s7 = smov %s980_s8 }
 0x212   : > { %s1254_s8 = smov %s1069_s20  ;;  %s1255_s9 = smov %s988_s10 }
 0x213   : > { %s1256_s10 = smov %s1258_s14  ;;  %16 = sbr.rel (!%p14_p2) target bundleno = 6 (0x6), region = 76 }
 0x218   :  { %721 = vsyncpa [#allocation3], 1 }
 0x219   :  { %723 = vsyncpa [#allocation3 + $0x1], 1 }
 0x21a   :  { %724 = vsyncpa [#allocation4], 1 }
 0x21b   :  { %726 = vsyncpa [#allocation4 + $0x1], 1 }

</bundles_post_ra>
